<compile_context>
chip_gen: v7x
topology: tpu7x:2x2x1
jax: 0.10.0
libtpu: 0.0.40
codegen_flags: <defaults>
</compile_context>

<pallas_src>
import functools

import jax
import jax.numpy as jnp
from jax.experimental import pallas as pl
from jax.experimental.pallas import tpu as pltpu

NUM_BINS = 16            # module hyperparameter (set deterministically in-script)
MAX_LANE = 1024          # lane-dense last dim (multiple of 128)
MAX_TILE_ROWS = 512      # 512*1024*4B = 2 MiB per f32 tile (v5e/v7x safe)
SMALL_INPUT_ELEMS = 256 * 1024   # below this, plain fused jnp wins


def _quantize_jnp(x, num_bins):
    """Pure-JAX reference / small-input path (same math as the torch module)."""
    y = jnp.clip((x + 1.0) * 0.5, 0.0, 1.0) * (num_bins - 1)
    disc = jnp.round(y).astype(jnp.int32)          # (round(y)+eps).long() == round(y)
    quant = disc.astype(jnp.float32) / (num_bins - 1) * 2.0 - 1.0
    return x + (quant - x)


def _quantizer_kernel(x_ref, o_ref, *, num_bins):
    x = x_ref[...]                                  # f32 tile in VMEM
    # Keep the module's evaluation order for bit-parity at bin boundaries.
    y = jnp.clip((x + 1.0) * 0.5, 0.0, 1.0) * (num_bins - 1)
    q = jnp.round(y)                                # exact integers in f32
    quant = q / (num_bins - 1) * 2.0 - 1.0
    o_ref[...] = x + (quant - x)                    # straight-through form


def _choose_layout(total):
    """Pick (lane, tile_rows, padded_total) for a lane-dense 2D slab."""
    # Largest multiple of 128 (<= MAX_LANE) that divides the element count
    # -> no padding, wrapper reshapes are free layout ops.
    lane = None
    for cand in range(MAX_LANE, 0, -128):
        if total % cand == 0:
            lane = cand
            break
    if lane is None:                                # rare fallback: pad < 1 row
        lane = MAX_LANE
    padded_total = pl.cdiv(total, lane) * lane
    rows = padded_total // lane

    # Row tile: multiple of 8, <= MAX_TILE_ROWS, and small enough that the
    # grid has >= 2 steps (v7x dual TensorCore) whenever rows allows it.
    cap = MAX_TILE_ROWS
    if rows >= 16:
        cap = min(cap, (rows // 2) // 8 * 8)
    tile_r = None
    for t in range(min(cap, rows) // 8 * 8, 0, -8):
        if rows % t == 0:
            tile_r = t
            break
    if tile_r is None:
        if rows <= MAX_TILE_ROWS:
            tile_r = rows                           # single full-extent block
        else:
            tile_r = max(cap, 8)                    # rare: pad rows to tile multiple
            padded_total = pl.cdiv(rows, tile_r) * tile_r * lane
    return lane, tile_r, padded_total


def integer_quantizer(x, num_bins=NUM_BINS, *, min_pallas_elems=SMALL_INPUT_ELEMS):
    """x: any-shape float tensor (e.g. NCHW). Returns quantized tensor, same shape/dtype."""
    orig_shape = x.shape
    orig_dtype = x.dtype
    xf = x.astype(jnp.float32)
    total = xf.size

    # Small-input bailout: fixed pallas_call dispatch dominates tiny tensors.
    if total == 0 or total < min_pallas_elems:
        return _quantize_jnp(xf, num_bins).reshape(orig_shape).astype(orig_dtype)

    lane, tile_r, padded_total = _choose_layout(total)

    flat = xf.reshape(-1)
    if padded_total != total:                       # rare fallback path
        flat = jnp.pad(flat, (0, padded_total - total))
    rows = padded_total // lane
    x2d = flat.reshape(rows, lane)

    kernel = functools.partial(_quantizer_kernel, num_bins=num_bins)
    out2d = pl.pallas_call(
        kernel,
        out_shape=jax.ShapeDtypeStruct((rows, lane), jnp.float32),
        grid=(rows // tile_r,),
        in_specs=[pl.BlockSpec((tile_r, lane), lambda i: (i, 0))],
        out_specs=pl.BlockSpec((tile_r, lane), lambda i: (i, 0)),
        compiler_params=pltpu.CompilerParams(
            dimension_semantics=("parallel",)),
        cost_estimate=pl.CostEstimate(
            flops=10 * total, transcendentals=0, bytes_accessed=8 * total),
    )(x2d)

    out_flat = out2d.reshape(-1)
    if padded_total != total:
        out_flat = out_flat[:total]
    return out_flat.reshape(orig_shape).astype(orig_dtype)


if __name__ == "__main__":
    key = jax.random.PRNGKey(0)
    # Small NCHW input consistent with a conv-style feature map.
    x = jax.random.uniform(key, (2, 4, 16, 16), dtype=jnp.float32,
                           minval=-1.2, maxval=1.2)

    # Force the Pallas path even at this small size so the kernel is exercised.
    out = integer_quantizer(x, num_bins=NUM_BINS, min_pallas_elems=0)
    out = jax.block_until_ready(out)

    # Also exercise the default small-input (fused jnp) path.
    out_small = jax.block_until_ready(integer_quantizer(x, num_bins=NUM_BINS))

    ref = _quantize_jnp(x, NUM_BINS)
    assert out.shape == x.shape and out.dtype == x.dtype
    assert jnp.max(jnp.abs(out - ref)) < 1e-6
    assert jnp.max(jnp.abs(out_small - ref)) < 1e-6

    print("KERNEL_OK")
</pallas_src>

<mosaic_0001>
module attributes {stable_mosaic.version = 11 : i64} {
  func.func @_quantizer_kernel(%arg0: i32, %arg1: memref<2x1024xf32, #tpu.memory_space<vmem>>, %arg2: memref<2x1024xf32, #tpu.memory_space<vmem>>) attributes {dimension_semantics = [#tpu.dimension_semantics<parallel>], iteration_bounds = array<i64: 1>, scalar_prefetch = 0 : i64, scratch_operands = 0 : i64, tpu.core_type = #tpu.core_type<tc>, window_params = [{transform_indices = @transform_0, window_bounds = array<i64: 2, 1024>}, {transform_indices = @transform_1, window_bounds = array<i64: 2, 1024>}]} {
    %c0 = arith.constant 0 : index
    %c0_0 = arith.constant 0 : index
    %0 = vector.load %arg1[%c0, %c0_0] : memref<2x1024xf32, #tpu.memory_space<vmem>>, vector<2x1024xf32>
    %cst = arith.constant 1.000000e+00 : f32
    %1 = vector.broadcast %cst : f32 to vector<2x1024xf32>
    %2 = arith.addf %0, %1 : vector<2x1024xf32>
    %cst_1 = arith.constant 5.000000e-01 : f32
    %3 = vector.broadcast %cst_1 : f32 to vector<2x1024xf32>
    %4 = arith.mulf %2, %3 : vector<2x1024xf32>
    %cst_2 = arith.constant 0.000000e+00 : f32
    %cst_3 = arith.constant 1.000000e+00 : f32
    %5 = vector.broadcast %cst_2 : f32 to vector<2x1024xf32>
    %6 = arith.maximumf %5, %4 : vector<2x1024xf32>
    %7 = vector.broadcast %cst_3 : f32 to vector<2x1024xf32>
    %8 = arith.minimumf %7, %6 : vector<2x1024xf32>
    %cst_4 = arith.constant 1.500000e+01 : f32
    %9 = vector.broadcast %cst_4 : f32 to vector<2x1024xf32>
    %10 = arith.mulf %8, %9 : vector<2x1024xf32>
    %11 = math.roundeven %10 : vector<2x1024xf32>
    %cst_5 = arith.constant 1.500000e+01 : f32
    %12 = vector.broadcast %cst_5 : f32 to vector<2x1024xf32>
    %13 = arith.divf %11, %12 : vector<2x1024xf32>
    %cst_6 = arith.constant 2.000000e+00 : f32
    %14 = vector.broadcast %cst_6 : f32 to vector<2x1024xf32>
    %15 = arith.mulf %13, %14 : vector<2x1024xf32>
    %cst_7 = arith.constant 1.000000e+00 : f32
    %16 = vector.broadcast %cst_7 : f32 to vector<2x1024xf32>
    %17 = arith.subf %15, %16 : vector<2x1024xf32>
    %18 = arith.subf %17, %0 : vector<2x1024xf32>
    %19 = arith.addf %0, %18 : vector<2x1024xf32>
    %c0_8 = arith.constant 0 : index
    %c0_9 = arith.constant 0 : index
    %20 = vector.load %arg2[%c0_8, %c0_9] : memref<2x1024xf32, #tpu.memory_space<vmem>>, vector<2x1024xf32>
    tpu.vector_store %arg2[%c0_8, %c0_9], %19 {strides = array<i32>} : memref<2x1024xf32, #tpu.memory_space<vmem>>, vector<2x1024xf32>,
    return
  }
  func.func @transform_0(%arg0: i32) -> (i32, i32) {
    %c0_i32 = arith.constant 0 : i32
    %c0_i32_0 = arith.constant 0 : i32
    return %arg0, %c0_i32 : i32, i32
  }
  func.func @transform_1(%arg0: i32) -> (i32, i32) {
    %c0_i32 = arith.constant 0 : i32
    %c0_i32_0 = arith.constant 0 : i32
    return %arg0, %c0_i32 : i32, i32
  }
}

</mosaic_0001>

<bundles_post_ra>
// kernel: tpu_custom_call.1
= control target key start
LH: loop header
LB: loop body
LE: loop exit
PB: predicated region body
PF: predicated region fallthrough
CT: control target
= control target key end

     0   :  { %6 = vsyncpa [#allocation3], 0  ;;  %s153_s0 = inlined_call_operand.hbm [shape: f32[2,1024], index: 0, kind: input, shape index: {}]   ;;  %s154_s1 = inlined_call_operand.hbm [shape: f32[2,1024], index: 1, kind: output, shape index: {}]  }
   0x1   :  { %7 = vsyncpa [#allocation4], 0  ;;  %s117_s6 = smov [#allocation2]   ;;  %s69_s10 = scalar_lea.hbm %s153_s0, 256 }
   0x2   :  { %s14_s7 = sshll.u32 %s117_s6, 4  ;;  %p70_p0 = scmp.ne.s32.totalorder %s153_s0, %s69_s10  ;;  %s15_s7 = int_to_ptr.vmem [resolvable:$true] %s14_s7 }
   0x3   :  { %p73_p1 = scmp.lt.u32.totalorder %s69_s10, %s153_s0 }
   0x5   :  { %p75_p2 = pnand %p73_p1, %p70_p0 }
   0x7   :  { %78 = shalt.err (!%p75_p2)
}
   0x8   :  { %s79_s15 = scalar_lea.vmem %s15_s7, 256  ;;  %p84_p4 = scmp.lt.s32.totalorder %s15_s7, %s15_s7 }
   0x9   :  { %p80_p3 = scmp.ne.s32.totalorder %s15_s7, %s79_s15  ;;  %p85_p5 = scmp.lt.s32.totalorder %s79_s15, %s79_s15 }
   0xb   :  { %p86_p6 = por %p85_p5, %p84_p4 }
   0xd   :  { %p87_p7 = pnand %p86_p6, %p80_p3 }
   0xf   :  { %90 = shalt.err (!%p87_p7)
}
  0x10   :  { %17 = dma.hbm_to_vmem [thread:$0]  %s153_s0, 256, %s15_s7, [#allocation3]  }
  0x11   :  { %113 = dma.done.wait [#allocation3], 256  }
  0x12   :  { %114 = vsyncadd [#allocation3], 4294967040  ;;  %v21_v0 = vld [vmem:[#allocation2] sm:$0xff]  ;;  %v22_v1 = vld [vmem:[#allocation2 + $0x8] sm:$0xff]  ;;  %s118_s0 = smov [#allocation5]  }
  0x13   :  { %v23_v2 = vadd.f32 1.0, %v21_v0  ;;  %v24_v3 = vadd.f32 1.0, %v22_v1  ;;  %s54_s18 = sshll.u32 %s118_s0, 4  ;;  %s55_s18 = int_to_ptr.vmem [resolvable:$true] %s54_s18 }
  0x14   :  { %s91_s19 = scalar_lea.vmem %s55_s18, 256  ;;  %p96_p9 = scmp.lt.s32.totalorder %s55_s18, %s55_s18 }
  0x15   :  { %v25_v4 = vmul.f32 0.5, %v23_v2  ;;  %v26_v5 = vmul.f32 0.5, %v24_v3  ;;  %p92_p8 = scmp.ne.s32.totalorder %s55_s18, %s91_s19  ;;  %p97_p10 = scmp.lt.s32.totalorder %s91_s19, %s91_s19 }
  0x17   :  { %v27_v6 = vmax.f32 %v25_v4, 0.0  ;;  %v28_v7 = vmax.f32 %v26_v5, 0.0  ;;  %p98_p11 = por %p97_p10, %p96_p9 }
  0x19   :  { %v29_v8 = vmin.f32 %v27_v6, 1.0  ;;  %v30_v9 = vmin.f32 %v28_v7, 1.0  ;;  %p99_p12 = pnand %p98_p11, %p92_p8 }
  0x1b   :  { %v31_v10 = vmul.f32 15.0, %v29_v8  ;;  %v32_v11 = vmul.f32 15.0, %v30_v9 }
  0x1d   :  { %v65_v12 = vround.rtne.f32 %v31_v10  ;;  %v66_v13 = vround.rtne.f32 %v32_v11 }
  0x1f   :  { %v36_v14 = vmul.f32 0.06666667, %v65_v12  ;;  %v37_v15 = vmul.f32 0.06666667, %v66_v13 }
  0x21   :  { %v38_v16 = vmul.f32 2.0, %v36_v14  ;;  %v39_v17 = vmul.f32 2.0, %v37_v15 }
  0x23   :  { %v63_v18 = vadd.f32 -1.0, %v38_v16  ;;  %v64_v19 = vadd.f32 -1.0, %v39_v17 }
  0x25   :  { %v42_v20 = vsub.f32 %v63_v18, %v21_v0  ;;  %v43_v21 = vsub.f32 %v64_v19, %v22_v1 }
  0x27   :  { %v44_v22 = vadd.f32 %v42_v20, %v21_v0  ;;  %v45_v23 = vadd.f32 %v43_v21, %v22_v1 }
  0x29   :  { %46 = vst [vmem:[#allocation5] sm:$0xff] %v44_v22  ;;  %47 = vst [vmem:[#allocation5 + $0x8] sm:$0xff] %v45_v23 }
  0x2a   :  { %102 = shalt.err (!%p99_p12)
}
  0x2b   :  { %s103_s22 = scalar_lea.hbm %s154_s1, 256 }
  0x2c   :  { %p104_p13 = scmp.ne.s32.totalorder %s154_s1, %s103_s22  ;;  %p107_p0 = scmp.lt.u32.totalorder %s103_s22, %s154_s1 }
  0x2e   :  { %p109_p1 = pnand %p107_p0, %p104_p13 }
  0x30   :  { %112 = shalt.err (!%p109_p1)
}
  0x31   :  { %57 = dma.vmem_to_hbm [thread:$0]  %s55_s18, 256, %s154_s1, [#allocation4]  }
  0x32   :  { %115 = dma.done.wait [#allocation4], 256  }
  0x33   :  { %116 = vsyncadd [#allocation4], 4294967040 }
  0x34   :  { %61 = vsyncpa [#allocation3], 1 }
  0x35   :  { %62 = vsyncpa [#allocation4], 1 }

</bundles_post_ra>
